<compile_context>
chip_gen: v5e
topology: v5e:2x2
jax: 0.10.0
libtpu: 0.0.40
codegen_flags: <defaults>
</compile_context>

<pallas_src>
import functools

import jax
import jax.numpy as jnp
from jax.experimental import pallas as pl
from jax.experimental.pallas import tpu as pltpu

LANE = 128     # lane width: last-dim alignment target
SUBLANE = 8    # sublane width: second-to-last-dim alignment target


def _ceil_to(x: int, m: int) -> int:
    return ((x + m - 1) // m) * m


# --------------------------------------------------------------------------
# Kernel
# --------------------------------------------------------------------------
def _mlp_kernel(x_ref, w1_ref, b1_ref, w2_ref, b2_ref, w3_ref, b3_ref, o_ref):
    """One batch tile: out = relu(relu(x@W1+b1)@W2+b2)@W3+b3 (f32 accumulate)."""
    wdt = w1_ref.dtype
    x = x_ref[...].astype(wdt)

    # Layer 1: Linear(input_dim -> hidden_p) + ReLU
    h = jnp.dot(x, w1_ref[...], preferred_element_type=jnp.float32)
    h = jnp.maximum(h + b1_ref[...], 0.0)

    # Layer 2: Linear(hidden_p -> hidden2_p) + ReLU
    h = jnp.dot(h.astype(wdt), w2_ref[...], preferred_element_type=jnp.float32)
    h = jnp.maximum(h + b2_ref[...], 0.0)

    # Layer 3: Linear(hidden2_p -> output_p)
    out = jnp.dot(h.astype(wdt), w3_ref[...], preferred_element_type=jnp.float32)
    out = out + b3_ref[...]

    o_ref[...] = out.astype(o_ref.dtype)


# --------------------------------------------------------------------------
# One-time parameter preparation (NOT per forward call)
# --------------------------------------------------------------------------
def prepare_params(w1, b1, w2, b2, w3, b3, *, weight_dtype=None):
    """Transpose PyTorch [out,in] weights to [in,out], zero-pad feature dims to
    multiples of 128 lanes, optionally cast weights (e.g. bf16). Do this once
    and reuse the result for every forward call."""
    def prep(w, b):
        out_f, _ = w.shape
        out_p = _ceil_to(out_f, LANE)
        w_io = jnp.pad(w.T, ((0, 0), (0, out_p - out_f)))            # [in, out_p]
        b_row = jnp.pad(b, (0, out_p - out_f)).reshape(1, out_p)     # [1, out_p]
        if weight_dtype is not None:
            w_io = w_io.astype(weight_dtype)
        return w_io, b_row.astype(jnp.float32)

    w1p, b1p = prep(w1, b1)
    w2p, b2p = prep(w2, b2)
    w3p, b3p = prep(w3, b3)
    # Layer 2/3 contraction dims must match the (padded) widths of the
    # previous layer's output; padded rows multiply zero activations.
    w2p = jnp.pad(w2p, ((0, b1p.shape[1] - w2p.shape[0]), (0, 0)))
    w3p = jnp.pad(w3p, ((0, b2p.shape[1] - w3p.shape[0]), (0, 0)))
    return (w1p, b1p, w2p, b2p, w3p, b3p)


# --------------------------------------------------------------------------
# Forward wrapper
# --------------------------------------------------------------------------
@functools.partial(jax.jit, static_argnames=("out_dim", "block_b"))
def non_linear_forward(x, params, *, out_dim, block_b=512):
    """x: [B, input_dim]; params: output of prepare_params; returns [B, out_dim]."""
    w1, b1, w2, b2, w3, b3 = params
    batch, d_in = x.shape
    assert w1.shape[0] == d_in, "input_dim mismatch with prepared params"
    h_p, h2_p, d_out_p = w1.shape[1], w2.shape[1], w3.shape[1]

    # Batch tile: big enough to amortize the ~0.35us/step grid overhead, but
    # never larger than the (sublane-rounded) batch itself.
    tb = _ceil_to(min(block_b, _ceil_to(batch, SUBLANE)), SUBLANE)
    b_pad = _ceil_to(batch, tb)
    if b_pad != batch:
        x = jnp.pad(x, ((0, b_pad - batch), (0, 0)))
    grid = (b_pad // tb,)

    # VMEM budget: resident weights/biases + double-buffered x/out tiles +
    # f32 intermediates, with 2x headroom (capped well under 64 MiB for v7x).
    nbytes = lambda a: a.size * a.dtype.itemsize
    weight_bytes = sum(nbytes(a) for a in (w1, b1, w2, b2, w3, b3))
    act_bytes = 2 * tb * max(h_p, h2_p, d_out_p) * 4
    io_bytes = 2 * (tb * d_in * x.dtype.itemsize + tb * d_out_p * x.dtype.itemsize)
    vmem_limit = int(max(32 << 20, min(56 << 20, 2 * (weight_bytes + act_bytes + io_bytes))))

    out_padded = pl.pallas_call(
        _mlp_kernel,
        out_shape=jax.ShapeDtypeStruct((b_pad, d_out_p), x.dtype),
        grid_spec=pltpu.PrefetchScalarGridSpec(
            num_scalar_prefetch=0,
            grid=grid,
            in_specs=[
                pl.BlockSpec((tb, d_in), lambda i: (i, 0)),   # x: tiled over batch
                pl.BlockSpec(w1.shape, lambda i: (0, 0)),     # weights/biases stay
                pl.BlockSpec(b1.shape, lambda i: (0, 0)),     # VMEM-resident across
                pl.BlockSpec(w2.shape, lambda i: (0, 0)),     # all grid steps
                pl.BlockSpec(b2.shape, lambda i: (0, 0)),
                pl.BlockSpec(w3.shape, lambda i: (0, 0)),
                pl.BlockSpec(b3.shape, lambda i: (0, 0)),
            ],
            out_specs=pl.BlockSpec((tb, d_out_p), lambda i: (i, 0)),
        ),
        compiler_params=pltpu.CompilerParams(
            dimension_semantics=("parallel",),   # batch axis -> both TCs on v7x
            vmem_limit_bytes=vmem_limit,
        ),
    )(x, w1, b1, w2, b2, w3, b3)

    return out_padded[:batch, :out_dim]


# --------------------------------------------------------------------------
# Init + pure-JAX reference (PyTorch layout / semantics)
# --------------------------------------------------------------------------
def init_params(key, input_dim, hidden_dim, output_dim, dtype=jnp.float32):
    """PyTorch-style nn.Linear init, weights in PyTorch [out, in] layout."""
    def linear_init(k, out_f, in_f):
        kw, kb = jax.random.split(k)
        bound = 1.0 / jnp.sqrt(in_f)
        w = jax.random.uniform(kw, (out_f, in_f), dtype, -bound, bound)
        b = jax.random.uniform(kb, (out_f,), dtype, -bound, bound)
        return w, b

    k1, k2, k3 = jax.random.split(key, 3)
    w1, b1 = linear_init(k1, hidden_dim, input_dim)
    w2, b2 = linear_init(k2, hidden_dim // 2, hidden_dim)
    w3, b3 = linear_init(k3, output_dim, hidden_dim // 2)
    return w1, b1, w2, b2, w3, b3


def reference_forward(x, w1, b1, w2, b2, w3, b3):
    h = jnp.maximum(x @ w1.T + b1, 0.0)
    h = jnp.maximum(h @ w2.T + b2, 0.0)
    return h @ w3.T + b3


# NOTE: the PyTorch module's `evaluate()` is a host-side eval loop over a
# DataLoader; it is not a kernel and is intentionally not translated.

if __name__ == "__main__":
    input_dim, hidden_dim, output_dim = 32, 32, 8
    batch = 200  # not a multiple of the tile -> exercises batch padding

    key = jax.random.PRNGKey(0)
    kx, kp = jax.random.split(key)
    x = jax.random.normal(kx, (batch, input_dim), jnp.float32)
    torch_params = init_params(kp, input_dim, hidden_dim, output_dim)

    # ---- f32 path (exactness check against the reference) ----
    params_f32 = prepare_params(*torch_params)
    out = non_linear_forward(x, params_f32, out_dim=output_dim)
    out = jax.block_until_ready(out)

    ref = reference_forward(x, *torch_params)
    assert out.shape == (batch, output_dim)
    assert jnp.allclose(out, ref, atol=1e-3, rtol=1e-3)

    # ---- bf16-weight path (halved HBM/VMEM footprint; f32 accumulate) ----
    params_bf16 = prepare_params(*torch_params, weight_dtype=jnp.bfloat16)
    out_bf16 = jax.block_until_ready(
        non_linear_forward(x, params_bf16, out_dim=output_dim))
    assert out_bf16.shape == (batch, output_dim)

    print("KERNEL_OK")
</pallas_src>

<mosaic_0001>
module attributes {stable_mosaic.version = 11 : i64} {
  func.func @_mlp_kernel(%arg0: i32, %arg1: memref<200x32xf32, #tpu.memory_space<vmem>>, %arg2: memref<32x128xf32, #tpu.memory_space<vmem>>, %arg3: memref<1x128xf32, #tpu.memory_space<vmem>>, %arg4: memref<128x128xf32, #tpu.memory_space<vmem>>, %arg5: memref<1x128xf32, #tpu.memory_space<vmem>>, %arg6: memref<128x128xf32, #tpu.memory_space<vmem>>, %arg7: memref<1x128xf32, #tpu.memory_space<vmem>>, %arg8: memref<200x128xf32, #tpu.memory_space<vmem>>) attributes {dimension_semantics = [#tpu.dimension_semantics<parallel>], iteration_bounds = array<i64: 1>, scalar_prefetch = 0 : i64, scratch_operands = 0 : i64, tpu.core_type = #tpu.core_type<tc>, window_params = [{transform_indices = @transform_0, window_bounds = array<i64: 200, 32>}, {pipeline_mode = #tpu.pipeline_mode<synchronous>, transform_indices = @transform_1, window_bounds = array<i64: 32, 128>}, {pipeline_mode = #tpu.pipeline_mode<synchronous>, transform_indices = @transform_2, window_bounds = array<i64: 1, 128>}, {pipeline_mode = #tpu.pipeline_mode<synchronous>, transform_indices = @transform_3, window_bounds = array<i64: 128, 128>}, {pipeline_mode = #tpu.pipeline_mode<synchronous>, transform_indices = @transform_4, window_bounds = array<i64: 1, 128>}, {pipeline_mode = #tpu.pipeline_mode<synchronous>, transform_indices = @transform_5, window_bounds = array<i64: 128, 128>}, {pipeline_mode = #tpu.pipeline_mode<synchronous>, transform_indices = @transform_6, window_bounds = array<i64: 1, 128>}, {transform_indices = @transform_7, window_bounds = array<i64: 200, 128>}]} {
    %c0 = arith.constant 0 : index
    %c0_0 = arith.constant 0 : index
    %0 = vector.load %arg1[%c0, %c0_0] : memref<200x32xf32, #tpu.memory_space<vmem>>, vector<200x32xf32>
    %c0_1 = arith.constant 0 : index
    %c0_2 = arith.constant 0 : index
    %1 = vector.load %arg2[%c0_1, %c0_2] : memref<32x128xf32, #tpu.memory_space<vmem>>, vector<32x128xf32>
    %cst = arith.constant dense<0.000000e+00> : vector<200x128xf32>
    %2 = tpu.matmul %0, %1, %cst {dimension_numbers = #tpu.dot_dimension_numbers<[1], [0], [0], [1], [0, 0, 1, 1], [], []>} : vector<200x32xf32>, vector<32x128xf32>, vector<200x128xf32> -> vector<200x128xf32>
    %c0_3 = arith.constant 0 : index
    %c0_4 = arith.constant 0 : index
    %3 = vector.load %arg3[%c0_3, %c0_4] : memref<1x128xf32, #tpu.memory_space<vmem>>, vector<1x128xf32>
    %4 = vector.broadcast %3 : vector<1x128xf32> to vector<200x128xf32>
    %5 = arith.addf %2, %4 : vector<200x128xf32>
    %cst_5 = arith.constant 0.000000e+00 : f32
    %6 = vector.broadcast %cst_5 : f32 to vector<200x128xf32>
    %7 = arith.maximumf %5, %6 : vector<200x128xf32>
    %c0_6 = arith.constant 0 : index
    %c0_7 = arith.constant 0 : index
    %8 = vector.load %arg4[%c0_6, %c0_7] : memref<128x128xf32, #tpu.memory_space<vmem>>, vector<128x128xf32>
    %cst_8 = arith.constant dense<0.000000e+00> : vector<200x128xf32>
    %9 = tpu.matmul %7, %8, %cst_8 {dimension_numbers = #tpu.dot_dimension_numbers<[1], [0], [0], [1], [0, 0, 1, 1], [], []>} : vector<200x128xf32>, vector<128x128xf32>, vector<200x128xf32> -> vector<200x128xf32>
    %c0_9 = arith.constant 0 : index
    %c0_10 = arith.constant 0 : index
    %10 = vector.load %arg5[%c0_9, %c0_10] : memref<1x128xf32, #tpu.memory_space<vmem>>, vector<1x128xf32>
    %11 = vector.broadcast %10 : vector<1x128xf32> to vector<200x128xf32>
    %12 = arith.addf %9, %11 : vector<200x128xf32>
    %cst_11 = arith.constant 0.000000e+00 : f32
    %13 = vector.broadcast %cst_11 : f32 to vector<200x128xf32>
    %14 = arith.maximumf %12, %13 : vector<200x128xf32>
    %c0_12 = arith.constant 0 : index
    %c0_13 = arith.constant 0 : index
    %15 = vector.load %arg6[%c0_12, %c0_13] : memref<128x128xf32, #tpu.memory_space<vmem>>, vector<128x128xf32>
    %cst_14 = arith.constant dense<0.000000e+00> : vector<200x128xf32>
    %16 = tpu.matmul %14, %15, %cst_14 {dimension_numbers = #tpu.dot_dimension_numbers<[1], [0], [0], [1], [0, 0, 1, 1], [], []>} : vector<200x128xf32>, vector<128x128xf32>, vector<200x128xf32> -> vector<200x128xf32>
    %c0_15 = arith.constant 0 : index
    %c0_16 = arith.constant 0 : index
    %17 = vector.load %arg7[%c0_15, %c0_16] : memref<1x128xf32, #tpu.memory_space<vmem>>, vector<1x128xf32>
    %18 = vector.broadcast %17 : vector<1x128xf32> to vector<200x128xf32>
    %19 = arith.addf %16, %18 : vector<200x128xf32>
    %c0_17 = arith.constant 0 : index
    %c0_18 = arith.constant 0 : index
    %20 = vector.load %arg8[%c0_17, %c0_18] : memref<200x128xf32, #tpu.memory_space<vmem>>, vector<200x128xf32>
    tpu.vector_store %arg8[%c0_17, %c0_18], %19 {strides = array<i32>} : memref<200x128xf32, #tpu.memory_space<vmem>>, vector<200x128xf32>,
    return
  }
  func.func @transform_0(%arg0: i32) -> (i32, i32) {
    %c0_i32 = arith.constant 0 : i32
    %c0_i32_0 = arith.constant 0 : i32
    return %arg0, %c0_i32 : i32, i32
  }
  func.func @transform_1(%arg0: i32) -> (i32, i32) {
    %c0_i32 = arith.constant 0 : i32
    %c0_i32_0 = arith.constant 0 : i32
    %c0_i32_1 = arith.constant 0 : i32
    return %c0_i32, %c0_i32_0 : i32, i32
  }
  func.func @transform_2(%arg0: i32) -> (i32, i32) {
    %c0_i32 = arith.constant 0 : i32
    %c0_i32_0 = arith.constant 0 : i32
    %c0_i32_1 = arith.constant 0 : i32
    return %c0_i32, %c0_i32_0 : i32, i32
  }
  func.func @transform_3(%arg0: i32) -> (i32, i32) {
    %c0_i32 = arith.constant 0 : i32
    %c0_i32_0 = arith.constant 0 : i32
    %c0_i32_1 = arith.constant 0 : i32
    return %c0_i32, %c0_i32_0 : i32, i32
  }
  func.func @transform_4(%arg0: i32) -> (i32, i32) {
    %c0_i32 = arith.constant 0 : i32
    %c0_i32_0 = arith.constant 0 : i32
    %c0_i32_1 = arith.constant 0 : i32
    return %c0_i32, %c0_i32_0 : i32, i32
  }
  func.func @transform_5(%arg0: i32) -> (i32, i32) {
    %c0_i32 = arith.constant 0 : i32
    %c0_i32_0 = arith.constant 0 : i32
    %c0_i32_1 = arith.constant 0 : i32
    return %c0_i32, %c0_i32_0 : i32, i32
  }
  func.func @transform_6(%arg0: i32) -> (i32, i32) {
    %c0_i32 = arith.constant 0 : i32
    %c0_i32_0 = arith.constant 0 : i32
    %c0_i32_1 = arith.constant 0 : i32
    return %c0_i32, %c0_i32_0 : i32, i32
  }
  func.func @transform_7(%arg0: i32) -> (i32, i32) {
    %c0_i32 = arith.constant 0 : i32
    %c0_i32_0 = arith.constant 0 : i32
    return %arg0, %c0_i32 : i32, i32
  }
}

</mosaic_0001>

<bundles_post_ra>
// kernel: non_linear_forward.1
= control target key start
LH: loop header
LB: loop body
LE: loop exit
PB: predicated region body
PF: predicated region fallthrough
CT: control target
= control target key end

     0   :  { %12 = vsyncpa [#allocation3], 0  ;;  %s640_s27 = smov [#allocation2]   ;;  %s641_s29 = smov 128   ;;  %s1047_s0 = inlined_call_operand.vmem [shape: f32[200,32], index: 0, kind: input, shape index: {}]   ;;  %s1048_s1 = inlined_call_operand.hbm [shape: f32[32,128], index: 1, kind: input, shape index: {}]   ;;  %s1049_s2 = inlined_call_operand.vmem [shape: f32[1,128], index: 2, kind: input, shape index: {}]   ;;  %s1050_s3 = inlined_call_operand.vmem [shape: f32[128,128], index: 3, kind: input, shape index: {}]   ;;  %s1051_s4 = inlined_call_operand.vmem [shape: f32[1,128], index: 4, kind: input, shape index: {}]   ;;  %s1052_s5 = inlined_call_operand.vmem [shape: f32[128,128], index: 5, kind: input, shape index: {}]   ;;  %s1053_s6 = inlined_call_operand.vmem [shape: f32[1,128], index: 6, kind: input, shape index: {}]   ;;  %s1054_s7 = inlined_call_operand.vmem [shape: f32[200,128], index: 7, kind: output, shape index: {}]  }
   0x1   :  { %s19_s26 = sshll.u32 %s1048_s1, 4  ;;  %s21_s28 = sshll.u32 %s640_s27, 4  ;;  %s20_s26 = int_to_ptr.hbm [resolvable:$true] %s19_s26  ;;  %s22_s28 = int_to_ptr.vmem [resolvable:$true] %s21_s28 }
   0x2   :  { %s642_s30 = smov 8  }
   0x3   :  { %27 = dma.hbm_to_vmem [thread:$0]  %s20_s26, 512, %s22_s28, [#allocation3], %s641_s29, %s641_s29, %s642_s30  }
   0x4   :  { %638 = dma.done.wait [#allocation3], 512  }
   0x5   :  { %639 = vsyncadd [#allocation3], 4294966784  ;;  %v70_v0 = vld [vmem:[#allocation2 + $0x18] sm:$0xff]  ;;  %v69_v1 = vld [vmem:[#allocation2 + $0x10] sm:$0xff]  ;;  %vm75_vm0 = vcmask 261120  }
   0x6   :  { %163 = vmatpush.msra.mxu0 %v70_v0  ;;  %572 = vmatpush.msra.mxu3 %v70_v0  ;;  %v68_v2 = vld [vmem:[#allocation2 + $0x8] sm:$0xff]  ;;  %v67_v3 = vld [vmem:[#allocation2] sm:$0xff]  ;;  %v44_v6 = vld [vmem:[%s1047_s0 + $0x10] sm:$0xff] }
   0x7   :  { %v42_v4 = vld [vmem:[%s1047_s0] sm:$0xff]  ;;  %v43_v5 = vld [vmem:[%s1047_s0 + $0x8] sm:$0xff]  ;;  %v45_v7 = vld [vmem:[%s1047_s0 + $0x18] sm:$0xff] }
   0x8   :  { %164 = vmatpush.msra.mxu0 %v69_v1  ;;  %573 = vmatpush.msra.mxu3 %v69_v1  ;;  %v46_v8 = vld [vmem:[%s1047_s0 + $0x20] sm:$0xff]  ;;  %v47_v9 = vld [vmem:[%s1047_s0 + $0x28] sm:$0xff]  ;;  %v48_v10 = vld [vmem:[%s1047_s0 + $0x30] sm:$0xff] }
   0x9   :  { %v49_v11 = vld [vmem:[%s1047_s0 + $0x38] sm:$0xff]  ;;  %v50_v12 = vld [vmem:[%s1047_s0 + $0x40] sm:$0xff]  ;;  %v282_v14 = vld [vmem:[%s1050_s3 + $0x70] sm:$0xff] }
   0xa   :  { %165 = vmatpush.msra.mxu0 %v68_v2  ;;  %574 = vmatpush.msra.mxu3 %v68_v2  ;;  %v283_v13 = vld [vmem:[%s1050_s3 + $0x78] sm:$0xff]  ;;  %v281_v15 = vld [vmem:[%s1050_s3 + $0x68] sm:$0xff]  ;;  %v280_v17 = vld [vmem:[%s1050_s3 + $0x60] sm:$0xff] }
   0xb   :  { %288 = vmatpush.msra.mxu1 %v283_v13  ;;  %v51_v16 = vld [vmem:[%s1047_s0 + $0x48] sm:$0xff]  ;;  %v279_v18 = vld [vmem:[%s1050_s3 + $0x58] sm:$0xff]  ;;  %v278_v19 = vld [vmem:[%s1050_s3 + $0x50] sm:$0xff] }
   0xc   :  { %166 = vmatpush.msra.mxu0 %v67_v3  ;;  %575 = vmatpush.msra.mxu3 %v67_v3  ;;  %v277_v20 = vld [vmem:[%s1050_s3 + $0x48] sm:$0xff]  ;;  %v52_v21 = vld [vmem:[%s1047_s0 + $0x50] sm:$0xff]  ;;  %v276_v22 = vld [vmem:[%s1050_s3 + $0x40] sm:$0xff] }
   0xd   :  { %547 = vmatmul.msk.f32.vlgmr.msra.gmra.mxu0 %vm75_vm0, %v42_v4  ;;  %289 = vmatpush.msra.mxu1 %v282_v14  ;;  %v275_v23 = vld [vmem:[%s1050_s3 + $0x38] sm:$0xff]  ;;  %v274_v24 = vld [vmem:[%s1050_s3 + $0x30] sm:$0xff]  ;;  %v273_v25 = vld [vmem:[%s1050_s3 + $0x28] sm:$0xff] }
   0xe   :  { %576 = vmatpush.msrb.mxu3 %v283_v13  ;;  %v53_v26 = vld [vmem:[%s1047_s0 + $0x58] sm:$0xff]  ;;  %v272_v27 = vld [vmem:[%s1050_s3 + $0x20] sm:$0xff]  ;;  %v270_v29 = vld [vmem:[%s1050_s3 + $0x10] sm:$0xff] }
   0xf   :  { %290 = vmatpush.msra.mxu1 %v281_v15  ;;  %v271_v28 = vld [vmem:[%s1050_s3 + $0x18] sm:$0xff]  ;;  %v54_v30 = vld [vmem:[%s1047_s0 + $0x60] sm:$0xff]  ;;  %v269_v31 = vld [vmem:[%s1050_s3 + $0x8] sm:$0xff] }
  0x10   :  { %577 = vmatpush.msrb.mxu3 %v282_v14  ;;  %v268_v32 = vld [vmem:[%s1050_s3] sm:$0xff]  ;;  %v55_v33 = vld [vmem:[%s1047_s0 + $0x68] sm:$0xff]  ;;  %v56_v34 = vld [vmem:[%s1047_s0 + $0x70] sm:$0xff] }
  0x11   :  { %291 = vmatpush.msra.mxu1 %v280_v17  ;;  %v57_v35 = vld [vmem:[%s1047_s0 + $0x78] sm:$0xff]  ;;  %v801_v36 = vld [vmem:[%s1049_s2] ss:$0 sm:$0xff]  ;;  %v63_v41 = vld [vmem:[%s1047_s0 + $0xa8] sm:$0xff] }
  0x12   :  { %578 = vmatpush.msrb.mxu3 %v281_v15  ;;  %v58_v38 = vld [vmem:[%s1047_s0 + $0x80] sm:$0xff]  ;;  %v59_v43 = vld [vmem:[%s1047_s0 + $0x88] sm:$0xff]  ;;  %v64_v46 = vld [vmem:[%s1047_s0 + $0xb0] sm:$0xff] }
  0x13   :  { %292 = vmatpush.msra.mxu1 %v279_v18  ;;  %568 = vmatmul.msk.f32.vlgmr.msra.gmra.mxu3 %vm75_vm0, %v63_v41  ;;  %v60_v48 = vld [vmem:[%s1047_s0 + $0x90] sm:$0xff]  ;;  %v65_v51 = vld [vmem:[%s1047_s0 + $0xb8] sm:$0xff]  ;;  %v66_v56 = vld [vmem:[%s1047_s0 + $0xc0] sm:$0xff] }
  0x14   :  { %579 = vmatpush.msrb.mxu3 %v280_v17  ;;  %v61_v53 = vld [vmem:[%s1047_s0 + $0x98] sm:$0xff]  ;;  %v62_v58 = vld [vmem:[%s1047_s0 + $0xa0] sm:$0xff]  ;;  %v418_v14 = vld [vmem:[%s1052_s5 + $0x68] sm:$0xff] }
  0x15   :  { %548 = vmatmul.msk.f32.gmra.mxu0 %vm75_vm0, %v43_v5  ;;  %293 = vmatpush.msra.mxu1 %v278_v19  ;;  %v417_v15 = vld [vmem:[%s1052_s5 + $0x60] sm:$0xff] }
  0x16   :  { %580 = vmatpush.msrb.mxu3 %v279_v18 }
  0x17   :  { %294 = vmatpush.msra.mxu1 %v277_v20 }
  0x18   :  { %581 = vmatpush.msrb.mxu3 %v278_v19  ;;  %v415_v19 = vld [vmem:[%s1052_s5 + $0x50] sm:$0xff] }
  0x19   :  { %295 = vmatpush.msra.mxu1 %v276_v22 }
  0x1a   :  { %582 = vmatpush.msrb.mxu3 %v277_v20 }
  0x1b   :  { %296 = vmatpush.msra.mxu1 %v275_v23  ;;  %569 = vmatmul.msk.f32.gmra.mxu3 %vm75_vm0, %v64_v46 }
  0x1c   :  { %583 = vmatpush.msrb.mxu3 %v276_v22  ;;  %v413_v22 = vld [vmem:[%s1052_s5 + $0x40] sm:$0xff] }
  0x1d   :  { %549 = vmatmul.msk.f32.gmra.mxu0 %vm75_vm0, %v44_v6  ;;  %297 = vmatpush.msra.mxu1 %v274_v24 }
  0x1e   :  { %584 = vmatpush.msrb.mxu3 %v275_v23  ;;  %v412_v23 = vld [vmem:[%s1052_s5 + $0x38] sm:$0xff] }
  0x1f   :  { %298 = vmatpush.msra.mxu1 %v273_v25 }
  0x20   :  { %585 = vmatpush.msrb.mxu3 %v274_v24 }
  0x21   :  { %299 = vmatpush.msra.mxu1 %v272_v27 }
  0x22   :  { %586 = vmatpush.msrb.mxu3 %v273_v25 }
  0x23   :  { %300 = vmatpush.msra.mxu1 %v271_v28  ;;  %570 = vmatmul.msk.f32.gmra.mxu3 %vm75_vm0, %v65_v51 }
  0x24   :  { %587 = vmatpush.msrb.mxu3 %v272_v27 }
  0x25   :  { %550 = vmatmul.msk.f32.gmra.mxu0 %vm75_vm0, %v45_v7  ;;  %301 = vmatpush.msra.mxu1 %v270_v29 }
  0x26   :  { %588 = vmatpush.msrb.mxu3 %v271_v28  ;;  %v410_v28 = vld [vmem:[%s1052_s5 + $0x28] sm:$0xff] }
  0x27   :  { %302 = vmatpush.msra.mxu1 %v269_v31 }
  0x28   :  { %589 = vmatpush.msrb.mxu3 %v270_v29  ;;  %v409_v29 = vld [vmem:[%s1052_s5 + $0x20] sm:$0xff] }
  0x29   :  { %303 = vmatpush.msra.mxu1 %v268_v32 }
  0x2a   :  { %590 = vmatpush.msrb.mxu3 %v269_v31 }
  0x2b   :  { %571 = vmatmul.msk.f32.gmra.mxu3 %vm75_vm0, %v66_v56 }
  0x2c   :  { %591 = vmatpush.msrb.mxu3 %v268_v32 }
  0x2d   :  { %551 = vmatmul.msk.f32.gmra.mxu0 %vm75_vm0, %v46_v8 }
  0x35   :  { %552 = vmatmul.msk.f32.gmra.mxu0 %vm75_vm0, %v47_v9  ;;  %v420_v9 = vld [vmem:[%s1052_s5 + $0x78] sm:$0xff] }
  0x36   :  { %425 = vmatpush.msra.mxu2 %v420_v9  ;;  %592 = vmatpush.msra.mxu3 %v420_v9 }
  0x3d   :  { %553 = vmatmul.msk.f32.gmra.mxu0 %vm75_vm0, %v48_v10 }
  0x45   :  { %554 = vmatmul.msk.f32.gmra.mxu0 %vm75_vm0, %v49_v11 }
  0x4d   :  { %555 = vmatmul.msk.f32.gmra.mxu0 %vm75_vm0, %v50_v12  ;;  %v419_v12 = vld [vmem:[%s1052_s5 + $0x70] sm:$0xff] }
  0x4e   :  { %426 = vmatpush.msra.mxu2 %v419_v12  ;;  %593 = vmatpush.msra.mxu3 %v419_v12 }
  0x50   :  { %427 = vmatpush.msra.mxu2 %v418_v14  ;;  %594 = vmatpush.msra.mxu3 %v418_v14 }
  0x52   :  { %428 = vmatpush.msra.mxu2 %v417_v15  ;;  %595 = vmatpush.msra.mxu3 %v417_v15 }
  0x55   :  { %556 = vmatmul.msk.f32.gmra.mxu0 %vm75_vm0, %v51_v16  ;;  %v416_v16 = vld [vmem:[%s1052_s5 + $0x58] sm:$0xff] }
  0x56   :  { %429 = vmatpush.msra.mxu2 %v416_v16  ;;  %596 = vmatpush.msra.mxu3 %v416_v16 }
  0x58   :  { %430 = vmatpush.msra.mxu2 %v415_v19  ;;  %597 = vmatpush.msra.mxu3 %v415_v19 }
  0x5d   :  { %557 = vmatmul.msk.f32.gmra.mxu0 %vm75_vm0, %v52_v21  ;;  %v414_v21 = vld [vmem:[%s1052_s5 + $0x48] sm:$0xff] }
  0x5e   :  { %431 = vmatpush.msra.mxu2 %v414_v21  ;;  %598 = vmatpush.msra.mxu3 %v414_v21 }
  0x60   :  { %432 = vmatpush.msra.mxu2 %v413_v22  ;;  %599 = vmatpush.msra.mxu3 %v413_v22 }
  0x62   :  { %433 = vmatpush.msra.mxu2 %v412_v23  ;;  %600 = vmatpush.msra.mxu3 %v412_v23 }
  0x65   :  { %558 = vmatmul.msk.f32.gmra.mxu0 %vm75_vm0, %v53_v26  ;;  %v411_v26 = vld [vmem:[%s1052_s5 + $0x30] sm:$0xff] }
  0x66   :  { %434 = vmatpush.msra.mxu2 %v411_v26  ;;  %601 = vmatpush.msra.mxu3 %v411_v26 }
  0x68   :  { %435 = vmatpush.msra.mxu2 %v410_v28  ;;  %602 = vmatpush.msra.mxu3 %v410_v28 }
  0x6a   :  { %436 = vmatpush.msra.mxu2 %v409_v29  ;;  %603 = vmatpush.msra.mxu3 %v409_v29 }
  0x6d   :  { %559 = vmatmul.msk.f32.gmra.mxu0 %vm75_vm0, %v54_v30  ;;  %v408_v30 = vld [vmem:[%s1052_s5 + $0x18] sm:$0xff] }
  0x6e   :  { %437 = vmatpush.msra.mxu2 %v408_v30  ;;  %604 = vmatpush.msra.mxu3 %v408_v30 }
  0x75   :  { %560 = vmatmul.msk.f32.gmra.mxu0 %vm75_vm0, %v55_v33  ;;  %v407_v33 = vld [vmem:[%s1052_s5 + $0x10] sm:$0xff] }
  0x76   :  { %438 = vmatpush.msra.mxu2 %v407_v33  ;;  %605 = vmatpush.msra.mxu3 %v407_v33 }
  0x7d   :  { %561 = vmatmul.msk.f32.gmra.mxu0 %vm75_vm0, %v56_v34 }
  0x85   :  { %562 = vmatmul.msk.f32.gmra.mxu0 %vm75_vm0, %v57_v35  ;;  %v406_v35 = vld [vmem:[%s1052_s5 + $0x8] sm:$0xff] }
  0x86   :  { %439 = vmatpush.msra.mxu2 %v406_v35  ;;  %606 = vmatpush.msra.mxu3 %v406_v35 }
  0x8a   :  { %v168_v37 = vpop.f32.mrf.mxu0 }
  0x8b   :  { %v169_v39 = vadd.f32 %v801_v36, %v168_v37  ;;  %v405_v37 = vld [vmem:[%s1052_s5] sm:$0xff] }
  0x8c   :  { %440 = vmatpush.msra.mxu2 %v405_v37  ;;  %607 = vmatpush.msra.mxu3 %v405_v37 }
  0x8d   :  { %v243_v40 = vmax.f32 %v169_v39, 0.0  ;;  %563 = vmatmul.msk.f32.gmra.mxu0 %vm75_vm0, %v58_v38 }
  0x8f   :  { %304 = vmatmul.f32.vlgmr.msra.gmra.mxu1 %v243_v40 }
  0x92   :  { %v171_v42 = vpop.f32.mrf.mxu0 }
  0x93   :  { %v172_v44 = vadd.f32 %v801_v36, %v171_v42 }
  0x95   :  { %v244_v45 = vmax.f32 %v172_v44, 0.0  ;;  %564 = vmatmul.msk.f32.gmra.mxu0 %vm75_vm0, %v59_v43 }
  0x97   :  { %307 = vmatmul.f32.gmra.mxu1 %v244_v45 }
  0x9a   :  { %v174_v47 = vpop.f32.mrf.mxu0 }
  0x9b   :  { %v175_v49 = vadd.f32 %v801_v36, %v174_v47  ;;  %v906_v47 = vld [vmem:[%s1051_s4] ss:$0 sm:$0xff] }
  0x9d   :  { %v245_v50 = vmax.f32 %v175_v49, 0.0  ;;  %565 = vmatmul.msk.f32.gmra.mxu0 %vm75_vm0, %v60_v48 }
  0x9f   :  { %310 = vmatmul.f32.gmra.mxu1 %v245_v50 }
  0xa2   :  { %v177_v52 = vpop.f32.mrf.mxu0 }
  0xa3   :  { %v178_v54 = vadd.f32 %v801_v36, %v177_v52 }
  0xa5   :  { %v246_v55 = vmax.f32 %v178_v54, 0.0  ;;  %566 = vmatmul.msk.f32.gmra.mxu0 %vm75_vm0, %v61_v53 }
  0xa7   :  { %313 = vmatmul.f32.gmra.mxu1 %v246_v55 }
  0xaa   :  { %v180_v57 = vpop.f32.mrf.mxu0 }
  0xab   :  { %v181_v59 = vadd.f32 %v801_v36, %v180_v57 }
  0xad   :  { %v247_v60 = vmax.f32 %v181_v59, 0.0  ;;  %567 = vmatmul.msk.f32.gmra.mxu0 %vm75_vm0, %v62_v58 }
  0xaf   :  { %316 = vmatmul.f32.gmra.mxu1 %v247_v60 }
  0xb2   :  { %v183_v61 = vpop.f32.mrf.mxu0 }
  0xb3   :  { %v184_v62 = vadd.f32 %v801_v36, %v183_v61 }
  0xb5   :  { %v248_v63 = vmax.f32 %v184_v62, 0.0 }
  0xb7   :  { %319 = vmatmul.f32.gmra.mxu1 %v248_v63 }
  0xba   :  { %v186_v0 = vpop.f32.mrf.mxu0 }
  0xbb   :  { %v187_v1 = vadd.f32 %v801_v36, %v186_v0 }
  0xbd   :  { %v249_v2 = vmax.f32 %v187_v1, 0.0 }
  0xbf   :  { %322 = vmatmul.f32.gmra.mxu1 %v249_v2 }
  0xc2   :  { %v189_v3 = vpop.f32.mrf.mxu0 }
  0xc3   :  { %v190_v4 = vadd.f32 %v801_v36, %v189_v3 }
  0xc5   :  { %v250_v5 = vmax.f32 %v190_v4, 0.0 }
  0xc7   :  { %325 = vmatmul.f32.gmra.mxu1 %v250_v5 }
  0xca   :  { %v192_v6 = vpop.f32.mrf.mxu0 }
  0xcb   :  { %v193_v7 = vadd.f32 %v801_v36, %v192_v6 }
  0xcd   :  { %v251_v8 = vmax.f32 %v193_v7, 0.0  ;;  %v231_v7 = vpop.f32.mrf.mxu3 }
  0xce   :  { %v232_v15 = vadd.f32 %v801_v36, %v231_v7 }
  0xcf   :  { %328 = vmatmul.f32.gmra.mxu1 %v251_v8 }
  0xd2   :  { %v195_v10 = vpop.f32.mrf.mxu0 }
  0xd3   :  { %v196_v11 = vadd.f32 %v801_v36, %v195_v10 }
  0xd5   :  { %v252_v13 = vmax.f32 %v196_v11, 0.0  ;;  %v234_v16 = vpop.f32.mrf.mxu3 }
  0xd6   :  { %v235_v21 = vadd.f32 %v801_v36, %v234_v16 }
  0xd7   :  { %331 = vmatmul.f32.gmra.mxu1 %v252_v13 }
  0xd8   :  { %v265_v23 = vmax.f32 %v235_v21, 0.0 }
  0xda   :  { %v198_v17 = vpop.f32.mrf.mxu0 }
  0xdb   :  { %v199_v18 = vadd.f32 %v801_v36, %v198_v17  ;;  %v264_v17 = vmax.f32 %v232_v15, 0.0 }
  0xdd   :  { %v253_v20 = vmax.f32 %v199_v18, 0.0  ;;  %v237_v22 = vpop.f32.mrf.mxu3 }
  0xdf   :  { %334 = vmatmul.f32.gmra.mxu1 %v253_v20 }
  0xe2   :  { %v201_v24 = vpop.f32.mrf.mxu0 }
  0xe3   :  { %v202_v25 = vadd.f32 %v801_v36, %v201_v24 }
  0xe5   :  { %v254_v27 = vmax.f32 %v202_v25, 0.0  ;;  %v240_v30 = vpop.f32.mrf.mxu3 }
  0xe6   :  { %v241_v33 = vadd.f32 %v801_v36, %v240_v30 }
  0xe7   :  { %337 = vmatmul.f32.gmra.mxu1 %v254_v27  ;;  %v238_v27 = vadd.f32 %v801_v36, %v237_v22 }
  0xe9   :  { %v266_v28 = vmax.f32 %v238_v27, 0.0 }
  0xea   :  { %v204_v31 = vpop.f32.mrf.mxu0 }
  0xeb   :  { %v205_v32 = vadd.f32 %v801_v36, %v204_v31 }
  0xed   :  { %v255_v34 = vmax.f32 %v205_v32, 0.0 }
  0xef   :  { %340 = vmatmul.f32.gmra.mxu1 %v255_v34  ;;  %v267_v34 = vmax.f32 %v241_v33, 0.0 }
  0xf2   :  { %v207_v38 = vpop.f32.mrf.mxu0 }
  0xf3   :  { %v208_v39 = vadd.f32 %v801_v36, %v207_v38 }
  0xf5   :  { %v256_v40 = vmax.f32 %v208_v39, 0.0 }
  0xf7   :  { %343 = vmatmul.f32.gmra.mxu1 %v256_v40 }
  0xfa   :  { %v210_v41 = vpop.f32.mrf.mxu0 }
  0xfb   :  { %v211_v42 = vadd.f32 %v801_v36, %v210_v41 }
  0xfd   :  { %v257_v43 = vmax.f32 %v211_v42, 0.0 }
  0xff   :  { %346 = vmatmul.f32.gmra.mxu1 %v257_v43 }
 0x102   :  { %v213_v44 = vpop.f32.mrf.mxu0 }
 0x103   :  { %v214_v45 = vadd.f32 %v801_v36, %v213_v44 }
 0x105   :  { %v258_v46 = vmax.f32 %v214_v45, 0.0 }
 0x107   :  { %349 = vmatmul.f32.gmra.mxu1 %v258_v46 }
 0x10a   :  { %v216_v48 = vpop.f32.mrf.mxu0 }
 0x10b   :  { %v217_v49 = vadd.f32 %v801_v36, %v216_v48 }
 0x10c   :  { %v305_v50 = vpop.f32.mrf.mxu1 }
 0x10d   :  { %v259_v51 = vmax.f32 %v217_v49, 0.0  ;;  %v306_v52 = vadd.f32 %v906_v47, %v305_v50 }
 0x10f   :  { %v380_v53 = vmax.f32 %v306_v52, 0.0  ;;  %352 = vmatmul.f32.gmra.mxu1 %v259_v51 }
 0x111   :  { %441 = vmatmul.f32.vlgmr.msra.gmra.mxu2 %v380_v53 }
 0x112   :  { %v219_v54 = vpop.f32.mrf.mxu0 }
 0x113   :  { %v220_v55 = vadd.f32 %v801_v36, %v219_v54 }
 0x114   :  { %v308_v56 = vpop.f32.mrf.mxu1 }
 0x115   :  { %v260_v57 = vmax.f32 %v220_v55, 0.0  ;;  %v309_v58 = vadd.f32 %v906_v47, %v308_v56 }
 0x117   :  { %v381_v59 = vmax.f32 %v309_v58, 0.0  ;;  %355 = vmatmul.f32.gmra.mxu1 %v260_v57 }
 0x119   :  { %444 = vmatmul.f32.gmra.mxu2 %v381_v59 }
 0x11a   :  { %v222_v60 = vpop.f32.mrf.mxu0 }
 0x11b   :  { %v223_v61 = vadd.f32 %v801_v36, %v222_v60 }
 0x11c   :  { %v311_v62 = vpop.f32.mrf.mxu1 }
 0x11d   :  { %v261_v63 = vmax.f32 %v223_v61, 0.0  ;;  %v312_v0 = vadd.f32 %v906_v47, %v311_v62 }
 0x11f   :  { %v382_v1 = vmax.f32 %v312_v0, 0.0  ;;  %358 = vmatmul.f32.vlgmr.msrb.gmra.mxu3 %v261_v63  ;;  %v937_v63 = vld [vmem:[%s1053_s6] ss:$0 sm:$0xff] }
 0x121   :  { %447 = vmatmul.f32.gmra.mxu2 %v382_v1 }
 0x122   :  { %v225_v2 = vpop.f32.mrf.mxu0 }
 0x123   :  { %v226_v3 = vadd.f32 %v801_v36, %v225_v2 }
 0x124   :  { %v314_v4 = vpop.f32.mrf.mxu1 }
 0x125   :  { %v262_v5 = vmax.f32 %v226_v3, 0.0  ;;  %v315_v6 = vadd.f32 %v906_v47, %v314_v4 }
 0x127   :  { %v383_v8 = vmax.f32 %v315_v6, 0.0  ;;  %361 = vmatmul.f32.gmra.mxu3 %v262_v5 }
 0x129   :  { %450 = vmatmul.f32.gmra.mxu2 %v383_v8 }
 0x12a   :  { %v228_v9 = vpop.f32.mrf.mxu0 }
 0x12b   :  { %v229_v10 = vadd.f32 %v801_v36, %v228_v9 }
 0x12c   :  { %v317_v11 = vpop.f32.mrf.mxu1 }
 0x12d   :  { %v263_v12 = vmax.f32 %v229_v10, 0.0  ;;  %v318_v13 = vadd.f32 %v906_v47, %v317_v11 }
 0x12f   :  { %v384_v14 = vmax.f32 %v318_v13, 0.0  ;;  %364 = vmatmul.f32.gmra.mxu3 %v263_v12 }
 0x131   :  { %453 = vmatmul.f32.gmra.mxu2 %v384_v14 }
 0x134   :  { %v320_v18 = vpop.f32.mrf.mxu1 }
 0x135   :  { %v321_v19 = vadd.f32 %v906_v47, %v320_v18 }
 0x137   :  { %v385_v20 = vmax.f32 %v321_v19, 0.0  ;;  %367 = vmatmul.f32.gmra.mxu3 %v264_v17 }
 0x139   :  { %456 = vmatmul.f32.gmra.mxu2 %v385_v20 }
 0x13c   :  { %v323_v24 = vpop.f32.mrf.mxu1 }
 0x13d   :  { %v324_v25 = vadd.f32 %v906_v47, %v323_v24 }
 0x13f   :  { %v386_v26 = vmax.f32 %v324_v25, 0.0  ;;  %370 = vmatmul.f32.gmra.mxu3 %v265_v23 }
 0x141   :  { %459 = vmatmul.f32.gmra.mxu2 %v386_v26 }
 0x144   :  { %v326_v29 = vpop.f32.mrf.mxu1 }
 0x145   :  { %v327_v31 = vadd.f32 %v906_v47, %v326_v29 }
 0x147   :  { %v387_v32 = vmax.f32 %v327_v31, 0.0  ;;  %373 = vmatmul.f32.gmra.mxu3 %v266_v28 }
 0x149   :  { %462 = vmatmul.f32.gmra.mxu2 %v387_v32 }
 0x14c   :  { %v329_v35 = vpop.f32.mrf.mxu1 }
 0x14d   :  { %v330_v37 = vadd.f32 %v906_v47, %v329_v35 }
 0x14f   :  { %v388_v38 = vmax.f32 %v330_v37, 0.0  ;;  %376 = vmatmul.f32.gmra.mxu3 %v267_v34 }
 0x151   :  { %465 = vmatmul.f32.gmra.mxu2 %v388_v38 }
 0x154   :  { %v332_v39 = vpop.f32.mrf.mxu1 }
 0x155   :  { %v333_v40 = vadd.f32 %v906_v47, %v332_v39 }
 0x157   :  { %v389_v41 = vmax.f32 %v333_v40, 0.0 }
 0x159   :  { %468 = vmatmul.f32.gmra.mxu2 %v389_v41 }
 0x15c   :  { %v335_v42 = vpop.f32.mrf.mxu1 }
 0x15d   :  { %v336_v43 = vadd.f32 %v906_v47, %v335_v42 }
 0x15f   :  { %v390_v44 = vmax.f32 %v336_v43, 0.0 }
 0x161   :  { %471 = vmatmul.f32.gmra.mxu2 %v390_v44 }
 0x164   :  { %v338_v45 = vpop.f32.mrf.mxu1 }
 0x165   :  { %v339_v36 = vadd.f32 %v906_v47, %v338_v45 }
 0x167   :  { %v391_v46 = vmax.f32 %v339_v36, 0.0 }
 0x169   :  { %474 = vmatmul.f32.gmra.mxu2 %v391_v46 }
 0x16c   :  { %v341_v48 = vpop.f32.mrf.mxu1 }
 0x16d   :  { %v342_v49 = vadd.f32 %v906_v47, %v341_v48 }
 0x16f   :  { %v392_v50 = vmax.f32 %v342_v49, 0.0 }
 0x171   :  { %477 = vmatmul.f32.gmra.mxu2 %v392_v50 }
 0x174   :  { %v344_v51 = vpop.f32.mrf.mxu1 }
 0x175   :  { %v345_v52 = vadd.f32 %v906_v47, %v344_v51 }
 0x177   :  { %v393_v53 = vmax.f32 %v345_v52, 0.0 }
 0x179   :  { %480 = vmatmul.f32.gmra.mxu2 %v393_v53 }
 0x17c   :  { %v347_v54 = vpop.f32.mrf.mxu1 }
 0x17d   :  { %v348_v55 = vadd.f32 %v906_v47, %v347_v54 }
 0x17f   :  { %v394_v56 = vmax.f32 %v348_v55, 0.0 }
 0x181   :  { %483 = vmatmul.f32.gmra.mxu2 %v394_v56 }
 0x184   :  { %v350_v57 = vpop.f32.mrf.mxu1 }
 0x185   :  { %v351_v58 = vadd.f32 %v906_v47, %v350_v57 }
 0x187   :  { %v395_v59 = vmax.f32 %v351_v58, 0.0 }
 0x189   :  { %486 = vmatmul.f32.gmra.mxu2 %v395_v59 }
 0x18c   :  { %v353_v60 = vpop.f32.mrf.mxu1 }
 0x18d   :  { %v354_v61 = vadd.f32 %v906_v47, %v353_v60 }
 0x18f   :  { %v396_v62 = vmax.f32 %v354_v61, 0.0 }
 0x191   :  { %489 = vmatmul.f32.gmra.mxu2 %v396_v62 }
 0x194   :  { %v356_v0 = vpop.f32.mrf.mxu1  ;;  %v442_v1 = vpop.f32.mrf.mxu2 }
 0x195   :  { %v357_v2 = vadd.f32 %v906_v47, %v356_v0  ;;  %v443_v3 = vadd.f32 %v937_v63, %v442_v1 }
 0x197   :  { %v397_v4 = vmax.f32 %v357_v2, 0.0  ;;  %517 = vst [vmem:[%s1054_s7] sm:$0xff] %v443_v3 }
 0x199   :  { %492 = vmatmul.f32.gmra.mxu2 %v397_v4 }
 0x19c   :  { %v445_v5 = vpop.f32.mrf.mxu2 }
 0x19d   :  { %v446_v6 = vadd.f32 %v937_v63, %v445_v5 }
 0x19f   :  { %518 = vst [vmem:[%s1054_s7 + $0x8] sm:$0xff] %v446_v6 }
 0x1a2   :  { %v359_v7 = vpop.f32.mrf.mxu3 }
 0x1a3   :  { %v360_v8 = vadd.f32 %v906_v47, %v359_v7 }
 0x1a4   :  { %v448_v9 = vpop.f32.mrf.mxu2 }
 0x1a5   :  { %v398_v10 = vmax.f32 %v360_v8, 0.0  ;;  %v449_v11 = vadd.f32 %v937_v63, %v448_v9 }
 0x1a7   :  { %519 = vst [vmem:[%s1054_s7 + $0x10] sm:$0xff] %v449_v11  ;;  %495 = vmatmul.f32.vlgmr.msra.gmra.mxu3 %v398_v10 }
 0x1aa   :  { %v362_v12 = vpop.f32.mrf.mxu3 }
 0x1ab   :  { %v363_v13 = vadd.f32 %v906_v47, %v362_v12 }
 0x1ac   :  { %v451_v14 = vpop.f32.mrf.mxu2 }
 0x1ad   :  { %v399_v15 = vmax.f32 %v363_v13, 0.0  ;;  %v452_v16 = vadd.f32 %v937_v63, %v451_v14 }
 0x1af   :  { %520 = vst [vmem:[%s1054_s7 + $0x18] sm:$0xff] %v452_v16  ;;  %498 = vmatmul.f32.gmra.mxu3 %v399_v15 }
 0x1b2   :  { %v365_v17 = vpop.f32.mrf.mxu3 }
 0x1b3   :  { %v366_v18 = vadd.f32 %v906_v47, %v365_v17 }
 0x1b4   :  { %v454_v19 = vpop.f32.mrf.mxu2 }
 0x1b5   :  { %v400_v20 = vmax.f32 %v366_v18, 0.0  ;;  %v455_v21 = vadd.f32 %v937_v63, %v454_v19 }
 0x1b7   :  { %521 = vst [vmem:[%s1054_s7 + $0x20] sm:$0xff] %v455_v21  ;;  %501 = vmatmul.f32.gmra.mxu3 %v400_v20 }
 0x1ba   :  { %v368_v22 = vpop.f32.mrf.mxu3 }
 0x1bb   :  { %v369_v23 = vadd.f32 %v906_v47, %v368_v22 }
 0x1bc   :  { %v457_v24 = vpop.f32.mrf.mxu2 }
 0x1bd   :  { %v401_v25 = vmax.f32 %v369_v23, 0.0  ;;  %v458_v26 = vadd.f32 %v937_v63, %v457_v24 }
 0x1bf   :  { %522 = vst [vmem:[%s1054_s7 + $0x28] sm:$0xff] %v458_v26  ;;  %504 = vmatmul.f32.gmra.mxu3 %v401_v25 }
 0x1c2   :  { %v371_v27 = vpop.f32.mrf.mxu3 }
 0x1c3   :  { %v372_v28 = vadd.f32 %v906_v47, %v371_v27 }
 0x1c4   :  { %v460_v29 = vpop.f32.mrf.mxu2 }
 0x1c5   :  { %v402_v30 = vmax.f32 %v372_v28, 0.0  ;;  %v461_v31 = vadd.f32 %v937_v63, %v460_v29 }
 0x1c7   :  { %523 = vst [vmem:[%s1054_s7 + $0x30] sm:$0xff] %v461_v31  ;;  %507 = vmatmul.f32.gmra.mxu3 %v402_v30 }
 0x1ca   :  { %v374_v32 = vpop.f32.mrf.mxu3 }
 0x1cb   :  { %v375_v33 = vadd.f32 %v906_v47, %v374_v32 }
 0x1cc   :  { %v463_v34 = vpop.f32.mrf.mxu2 }
 0x1cd   :  { %v403_v35 = vmax.f32 %v375_v33, 0.0  ;;  %v464_v37 = vadd.f32 %v937_v63, %v463_v34 }
 0x1cf   :  { %524 = vst [vmem:[%s1054_s7 + $0x38] sm:$0xff] %v464_v37  ;;  %510 = vmatmul.f32.gmra.mxu3 %v403_v35 }
 0x1d2   :  { %v377_v38 = vpop.f32.mrf.mxu3 }
 0x1d3   :  { %v378_v39 = vadd.f32 %v906_v47, %v377_v38 }
 0x1d4   :  { %v466_v40 = vpop.f32.mrf.mxu2 }
 0x1d5   :  { %v404_v41 = vmax.f32 %v378_v39, 0.0  ;;  %v467_v42 = vadd.f32 %v937_v63, %v466_v40 }
 0x1d7   :  { %525 = vst [vmem:[%s1054_s7 + $0x40] sm:$0xff] %v467_v42  ;;  %513 = vmatmul.f32.gmra.mxu3 %v404_v41 }
 0x1dc   :  { %v469_v43 = vpop.f32.mrf.mxu2 }
 0x1dd   :  { %v470_v44 = vadd.f32 %v937_v63, %v469_v43 }
 0x1df   :  { %526 = vst [vmem:[%s1054_s7 + $0x48] sm:$0xff] %v470_v44 }
 0x1e4   :  { %v472_v45 = vpop.f32.mrf.mxu2 }
 0x1e5   :  { %v473_v36 = vadd.f32 %v937_v63, %v472_v45 }
 0x1e7   :  { %527 = vst [vmem:[%s1054_s7 + $0x50] sm:$0xff] %v473_v36 }
 0x1ec   :  { %v475_v47 = vpop.f32.mrf.mxu2 }
 0x1ed   :  { %v476_v46 = vadd.f32 %v937_v63, %v475_v47 }
 0x1ef   :  { %528 = vst [vmem:[%s1054_s7 + $0x58] sm:$0xff] %v476_v46 }
 0x1f4   :  { %v478_v48 = vpop.f32.mrf.mxu2 }
 0x1f5   :  { %v479_v49 = vadd.f32 %v937_v63, %v478_v48 }
 0x1f7   :  { %529 = vst [vmem:[%s1054_s7 + $0x60] sm:$0xff] %v479_v49 }
 0x1fc   :  { %v481_v50 = vpop.f32.mrf.mxu2 }
 0x1fd   :  { %v482_v51 = vadd.f32 %v937_v63, %v481_v50 }
 0x1ff   :  { %530 = vst [vmem:[%s1054_s7 + $0x68] sm:$0xff] %v482_v51 }
 0x204   :  { %v484_v52 = vpop.f32.mrf.mxu2 }
 0x205   :  { %v485_v53 = vadd.f32 %v937_v63, %v484_v52 }
 0x207   :  { %531 = vst [vmem:[%s1054_s7 + $0x70] sm:$0xff] %v485_v53 }
 0x20c   :  { %v487_v54 = vpop.f32.mrf.mxu2 }
 0x20d   :  { %v488_v55 = vadd.f32 %v937_v63, %v487_v54 }
 0x20f   :  { %532 = vst [vmem:[%s1054_s7 + $0x78] sm:$0xff] %v488_v55 }
 0x214   :  { %v490_v56 = vpop.f32.mrf.mxu2 }
 0x215   :  { %v491_v57 = vadd.f32 %v937_v63, %v490_v56 }
 0x217   :  { %533 = vst [vmem:[%s1054_s7 + $0x80] sm:$0xff] %v491_v57 }
 0x21c   :  { %v493_v58 = vpop.f32.mrf.mxu2 }
 0x21d   :  { %v494_v59 = vadd.f32 %v937_v63, %v493_v58 }
 0x21f   :  { %534 = vst [vmem:[%s1054_s7 + $0x88] sm:$0xff] %v494_v59 }
 0x22a   :  { %v496_v60 = vpop.f32.mrf.mxu3 }
 0x22b   :  { %v497_v61 = vadd.f32 %v937_v63, %v496_v60 }
 0x22d   :  { %535 = vst [vmem:[%s1054_s7 + $0x90] sm:$0xff] %v497_v61 }
 0x232   :  { %v499_v62 = vpop.f32.mrf.mxu3 }
 0x233   :  { %v500_v0 = vadd.f32 %v937_v63, %v499_v62 }
 0x235   :  { %536 = vst [vmem:[%s1054_s7 + $0x98] sm:$0xff] %v500_v0 }
 0x23a   :  { %v502_v1 = vpop.f32.mrf.mxu3 }
 0x23b   :  { %v503_v2 = vadd.f32 %v937_v63, %v502_v1 }
 0x23d   :  { %537 = vst [vmem:[%s1054_s7 + $0xa0] sm:$0xff] %v503_v2 }
 0x242   :  { %v505_v3 = vpop.f32.mrf.mxu3 }
 0x243   :  { %v506_v4 = vadd.f32 %v937_v63, %v505_v3 }
 0x245   :  { %538 = vst [vmem:[%s1054_s7 + $0xa8] sm:$0xff] %v506_v4 }
 0x24a   :  { %v508_v5 = vpop.f32.mrf.mxu3 }
 0x24b   :  { %v509_v6 = vadd.f32 %v937_v63, %v508_v5 }
 0x24d   :  { %539 = vst [vmem:[%s1054_s7 + $0xb0] sm:$0xff] %v509_v6 }
 0x252   :  { %v511_v7 = vpop.f32.mrf.mxu3 }
 0x253   :  { %v512_v8 = vadd.f32 %v937_v63, %v511_v7 }
 0x255   :  { %540 = vst [vmem:[%s1054_s7 + $0xb8] sm:$0xff] %v512_v8 }
 0x25a   :  { %v514_v9 = vpop.f32.mrf.mxu3 }
 0x25b   :  { %v515_v10 = vadd.f32 %v937_v63, %v514_v9 }
 0x25d   :  { %541 = vst [vmem:[%s1054_s7 + $0xc0] sm:$0xff] %v515_v10 }
 0x25e   :  { %546 = vsyncpa [#allocation3], 1 }

</bundles_post_ra>
